<compile_context>
chip_gen: v7x
topology: tpu7x:2x2x1
jax: 0.10.0
libtpu: 0.0.40
codegen_flags: <defaults>
</compile_context>

<pallas_src>
import math

import jax
import jax.numpy as jnp
from jax import lax
from jax.experimental import pallas as pl
from jax.experimental.pallas import tpu as pltpu


def _make_focal_kernel(gamma, epsilon, batch_size, block_cols):
    gamma_f = float(gamma)
    gamma_is_int = gamma_f.is_integer() and gamma_f >= 0.0
    gamma_int = int(gamma_f)
    log_eps = math.log(epsilon)          # lower clamp of log(p)
    log_1m_eps = math.log1p(-epsilon)    # upper clamp of log(p)

    def kernel(logits_ref, targets_ref, weights_ref, out_ref):
        i = pl.program_id(0)

        logits = logits_ref[...].astype(jnp.float32)   # (C, bm) class-major
        tgt = targets_ref[...]                         # (1, bm) int32
        w = weights_ref[...].astype(jnp.float32)       # (C, 1)

        C, bm = logits.shape

        # numerically stable softmax along the class (sublane) axis
        m = jnp.max(logits, axis=0, keepdims=True)     # (1, bm)
        shifted = logits - m
        e = jnp.exp(shifted)                           # per-element EUP #1
        denom = jnp.sum(e, axis=0, keepdims=True)      # (1, bm)
        inv_denom = pl.reciprocal(denom, approx=False)  # per-sample only
        p = jnp.clip(e * inv_denom, epsilon, 1.0 - epsilon)

        # log(p) via log-softmax: no per-element log, only a per-sample one.
        # Clamp in log space <=> torch.clamp(p, eps, 1-eps) followed by log.
        lp = jnp.clip(shifted - jnp.log(denom), log_eps, log_1m_eps)
        l1p = jnp.log1p(-p)                            # per-element EUP #2

        # (1-p)**gamma and p**gamma without float-exponent pow when possible
        if gamma_is_int and gamma_int == 2:
            omp = 1.0 - p
            pow_1mp = omp * omp
            pow_p = p * p
        elif gamma_is_int:
            pow_1mp = lax.integer_pow(1.0 - p, gamma_int)
            pow_p = lax.integer_pow(p, gamma_int)
        else:
            g = jnp.float32(gamma_f)
            pow_1mp = jnp.exp(g * l1p)
            pow_p = jnp.exp(g * lp)

        # single vselect instead of one-hot multiply/add
        class_ids = lax.broadcasted_iota(jnp.int32, (C, bm), 0)
        is_target = class_ids == tgt                   # (C, bm) bool
        per_elem = jnp.where(is_target, pow_1mp * lp, pow_p * l1p)

        # class-weighted sum over classes (VPU + sublane reduce, exact f32)
        per_sample = -jnp.sum(w * per_elem, axis=0, keepdims=True)   # (1, bm)

        # mask lanes beyond the real batch in a partial last block (select,
        # not multiply, so garbage rows can never propagate NaN/Inf)
        col_ids = i * block_cols + lax.broadcasted_iota(jnp.int32, (1, bm), 1)
        out_ref[...] = jnp.where(col_ids < batch_size, per_sample, 0.0)

    return kernel


def weighted_focal_loss(logits, targets, weights, gamma=2.0, epsilon=1e-7,
                        block_batch=None):
    """logits: (B, C) float, targets: (B,) int, weights: (C,) float -> scalar f32."""
    B, C = logits.shape

    # Class-major layout: classes on sublanes, batch on the 128-wide lane axis
    # (dense lanes / dense DMA for small C; keep batch-major only if C >= 128).
    logits_cm = logits.T                                   # (C, B), native dtype
    targets_row = targets.astype(jnp.int32).reshape(1, B)
    weights_col = jnp.asarray(weights, jnp.float32).reshape(C, 1)

    # Batch tile (lane dim).  Budget ~10 live (C, bm) f32 temporaries inside a
    # few MiB of VMEM; large tiles amortize per-grid-step overhead.
    if block_batch is None:
        budget = 8 * 1024 * 1024
        bm_cap = budget // (max(C, 1) * 4 * 10)
        bm_cap = max(128, min(2048, (bm_cap // 128) * 128))
    else:
        bm_cap = max(128, (int(block_batch) // 128) * 128)

    if B <= bm_cap:
        bm = B              # single block; block dims equal the full array dims
    else:
        bm = bm_cap         # multiple of 128; last block may be partial (masked)
    num_blocks = pl.cdiv(B, bm)

    per_sample = pl.pallas_call(
        _make_focal_kernel(gamma, epsilon, B, bm),
        out_shape=jax.ShapeDtypeStruct((1, B), jnp.float32),
        grid=(num_blocks,),
        in_specs=[
            pl.BlockSpec((C, bm), lambda i: (0, i)),   # logits (class-major)
            pl.BlockSpec((1, bm), lambda i: (0, i)),   # targets row
            pl.BlockSpec((C, 1), lambda i: (0, 0)),    # class weights column
        ],
        out_specs=pl.BlockSpec((1, bm), lambda i: (0, i)),
        compiler_params=pltpu.CompilerParams(
            dimension_semantics=("parallel",)),        # no accumulator -> v7x can split
    )(logits_cm, targets_row, weights_col)

    # Mean over the batch.  Out-of-bounds lanes of a partial last block were
    # where-masked to zero in-kernel and their writes dropped by Pallas, so
    # every stored lane is a real sample.
    return jnp.sum(per_sample) / B


def _reference_loss(logits, targets, weights, gamma=2.0, epsilon=1e-7):
    """Pure-JAX reference mirroring the PyTorch forward exactly."""
    C = logits.shape[1]
    one_hot = jax.nn.one_hot(targets, C, dtype=jnp.float32)
    p = jax.nn.softmax(logits.astype(jnp.float32), axis=1)
    p = jnp.clip(p, epsilon, 1.0 - epsilon)
    correct = (1.0 - p) ** gamma * one_hot * jnp.log(p)
    incorrect = p ** gamma * (1.0 - one_hot) * jnp.log(1.0 - p)
    weighted = weights[None, :].astype(jnp.float32) * (correct + incorrect)
    return jnp.mean(-jnp.sum(weighted, axis=1))


if __name__ == "__main__":
    key = jax.random.PRNGKey(0)

    # Test 1: module docstring shape (B=32, C=10), single block.
    B, C = 32, 10
    k1, k2, key = jax.random.split(key, 3)
    logits = jax.random.normal(k1, (B, C), dtype=jnp.float32)
    targets = jax.random.randint(k2, (B,), 0, C, dtype=jnp.int32)
    weights = jnp.linspace(0.5, 1.5, C, dtype=jnp.float32)

    loss = weighted_focal_loss(logits, targets, weights, gamma=2.0, epsilon=1e-7)
    loss = jax.block_until_ready(loss)
    ref = _reference_loss(logits, targets, weights, gamma=2.0, epsilon=1e-7)
    assert jnp.allclose(loss, ref, rtol=1e-5, atol=1e-6), (loss, ref)

    # Test 2: multi-block grid with a partial last block (masking path).
    B2, C2 = 300, 7
    k3, k4, key = jax.random.split(key, 3)
    logits2 = jax.random.normal(k3, (B2, C2), dtype=jnp.float32)
    targets2 = jax.random.randint(k4, (B2,), 0, C2, dtype=jnp.int32)
    weights2 = jnp.linspace(0.25, 2.0, C2, dtype=jnp.float32)

    loss2 = weighted_focal_loss(logits2, targets2, weights2, gamma=2.0,
                                epsilon=1e-7, block_batch=128)
    loss2 = jax.block_until_ready(loss2)
    ref2 = _reference_loss(logits2, targets2, weights2, gamma=2.0, epsilon=1e-7)
    assert jnp.allclose(loss2, ref2, rtol=1e-5, atol=1e-6), (loss2, ref2)

    print("KERNEL_OK")
</pallas_src>

<mosaic_0001>
module attributes {stable_mosaic.version = 11 : i64} {
  func.func @kernel(%arg0: i32, %arg1: memref<10x32xf32, #tpu.memory_space<vmem>>, %arg2: memref<1x32xi32, #tpu.memory_space<vmem>>, %arg3: memref<10x1xf32, #tpu.memory_space<vmem>>, %arg4: memref<1x32xf32, #tpu.memory_space<vmem>>) attributes {dimension_semantics = [#tpu.dimension_semantics<parallel>], iteration_bounds = array<i64: 1>, scalar_prefetch = 0 : i64, scratch_operands = 0 : i64, tpu.core_type = #tpu.core_type<tc>, window_params = [{transform_indices = @transform_0, window_bounds = array<i64: 10, 32>}, {transform_indices = @transform_1, window_bounds = array<i64: 1, 32>}, {pipeline_mode = #tpu.pipeline_mode<synchronous>, transform_indices = @transform_2, window_bounds = array<i64: 10, 1>}, {transform_indices = @transform_3, window_bounds = array<i64: 1, 32>}]} {
    %c0 = arith.constant 0 : index
    %c0_0 = arith.constant 0 : index
    %0 = vector.load %arg1[%c0, %c0_0] : memref<10x32xf32, #tpu.memory_space<vmem>>, vector<10x32xf32>
    %c0_1 = arith.constant 0 : index
    %c0_2 = arith.constant 0 : index
    %1 = vector.load %arg2[%c0_1, %c0_2] : memref<1x32xi32, #tpu.memory_space<vmem>>, vector<1x32xi32>
    %c0_3 = arith.constant 0 : index
    %c0_4 = arith.constant 0 : index
    %2 = vector.load %arg3[%c0_3, %c0_4] : memref<10x1xf32, #tpu.memory_space<vmem>>, vector<10x1xf32>
    %cst = arith.constant dense<0xFF800000> : vector<32xf32>
    %3 = vector.multi_reduction <maximumf>, %0, %cst [0] : vector<10x32xf32> to vector<32xf32>
    %4 = vector.shape_cast %3 : vector<32xf32> to vector<1x32xf32>
    %5 = vector.broadcast %4 : vector<1x32xf32> to vector<10x32xf32>
    %6 = arith.subf %0, %5 : vector<10x32xf32>
    %7 = math.exp %6 : vector<10x32xf32>
    %cst_5 = arith.constant dense<0.000000e+00> : vector<32xf32>
    %8 = vector.multi_reduction <add>, %7, %cst_5 [0] : vector<10x32xf32> to vector<32xf32>
    %9 = vector.shape_cast %8 : vector<32xf32> to vector<1x32xf32>
    %10 = tpu.reciprocal %9 : vector<1x32xf32> -> vector<1x32xf32>
    %11 = vector.broadcast %10 : vector<1x32xf32> to vector<10x32xf32>
    %12 = arith.mulf %7, %11 : vector<10x32xf32>
    %cst_6 = arith.constant 1.000000e-07 : f32
    %cst_7 = arith.constant 0.99999988 : f32
    %13 = vector.broadcast %cst_6 : f32 to vector<10x32xf32>
    %14 = arith.maximumf %13, %12 : vector<10x32xf32>
    %15 = vector.broadcast %cst_7 : f32 to vector<10x32xf32>
    %16 = arith.minimumf %15, %14 : vector<10x32xf32>
    %17 = math.log %9 : vector<1x32xf32>
    %18 = vector.broadcast %17 : vector<1x32xf32> to vector<10x32xf32>
    %19 = arith.subf %6, %18 : vector<10x32xf32>
    %cst_8 = arith.constant -16.1180954 : f32
    %cst_9 = arith.constant -1.00000008E-7 : f32
    %20 = vector.broadcast %cst_8 : f32 to vector<10x32xf32>
    %21 = arith.maximumf %20, %19 : vector<10x32xf32>
    %22 = vector.broadcast %cst_9 : f32 to vector<10x32xf32>
    %23 = arith.minimumf %22, %21 : vector<10x32xf32>
    %cst_10 = arith.constant 0.000000e+00 : f32
    %24 = vector.broadcast %cst_10 : f32 to vector<10x32xf32>
    %25 = arith.subf %24, %16 : vector<10x32xf32>
    %26 = math.log1p %25 : vector<10x32xf32>
    %cst_11 = arith.constant 1.000000e+00 : f32
    %27 = vector.broadcast %cst_11 : f32 to vector<10x32xf32>
    %28 = arith.subf %27, %16 : vector<10x32xf32>
    %29 = arith.mulf %28, %28 : vector<10x32xf32>
    %30 = arith.mulf %16, %16 : vector<10x32xf32>
    %31 = tpu.iota {dimensions = array<i32: 0>} : vector<10x32xi32>
    %32 = vector.broadcast %1 : vector<1x32xi32> to vector<10x32xi32>
    %33 = arith.cmpi eq, %31, %32 : vector<10x32xi32>
    %34 = arith.mulf %29, %23 : vector<10x32xf32>
    %35 = arith.mulf %30, %26 : vector<10x32xf32>
    %36 = arith.select %33, %34, %35 : vector<10x32xi1>, vector<10x32xf32>
    %37 = vector.broadcast %2 : vector<10x1xf32> to vector<10x32xf32>
    %38 = arith.mulf %37, %36 : vector<10x32xf32>
    %cst_12 = arith.constant dense<0.000000e+00> : vector<32xf32>
    %39 = vector.multi_reduction <add>, %38, %cst_12 [0] : vector<10x32xf32> to vector<32xf32>
    %40 = vector.shape_cast %39 : vector<32xf32> to vector<1x32xf32>
    %cst_13 = arith.constant 0.000000e+00 : f32
    %41 = vector.broadcast %cst_13 : f32 to vector<1x32xf32>
    %42 = arith.subf %41, %40 : vector<1x32xf32>
    %c32_i32 = arith.constant 32 : i32
    %43 = arith.muli %arg0, %c32_i32 : i32
    %44 = tpu.iota {dimensions = array<i32: 1>} : vector<1x32xi32>
    %45 = vector.broadcast %43 : i32 to vector<1x32xi32>
    %46 = arith.addi %45, %44 : vector<1x32xi32>
    %c32_i32_14 = arith.constant 32 : i32
    %47 = vector.broadcast %c32_i32_14 : i32 to vector<1x32xi32>
    %48 = arith.cmpi slt, %46, %47 : vector<1x32xi32>
    %cst_15 = arith.constant 0.000000e+00 : f32
    %49 = vector.broadcast %cst_15 : f32 to vector<1x32xf32>
    %50 = arith.select %48, %42, %49 : vector<1x32xi1>, vector<1x32xf32>
    %c0_16 = arith.constant 0 : index
    %c0_17 = arith.constant 0 : index
    %51 = vector.load %arg4[%c0_16, %c0_17] : memref<1x32xf32, #tpu.memory_space<vmem>>, vector<1x32xf32>
    tpu.vector_store %arg4[%c0_16, %c0_17], %50 {strides = array<i32>} : memref<1x32xf32, #tpu.memory_space<vmem>>, vector<1x32xf32>,
    return
  }
  func.func @transform_0(%arg0: i32) -> (i32, i32) {
    %c0_i32 = arith.constant 0 : i32
    %c0_i32_0 = arith.constant 0 : i32
    return %c0_i32, %arg0 : i32, i32
  }
  func.func @transform_1(%arg0: i32) -> (i32, i32) {
    %c0_i32 = arith.constant 0 : i32
    %c0_i32_0 = arith.constant 0 : i32
    return %c0_i32, %arg0 : i32, i32
  }
  func.func @transform_2(%arg0: i32) -> (i32, i32) {
    %c0_i32 = arith.constant 0 : i32
    %c0_i32_0 = arith.constant 0 : i32
    %c0_i32_1 = arith.constant 0 : i32
    return %c0_i32, %c0_i32_0 : i32, i32
  }
  func.func @transform_3(%arg0: i32) -> (i32, i32) {
    %c0_i32 = arith.constant 0 : i32
    %c0_i32_0 = arith.constant 0 : i32
    return %c0_i32, %arg0 : i32, i32
  }
}

</mosaic_0001>

<bundles_post_ra>
// kernel: tpu_custom_call.1
= control target key start
LH: loop header
LB: loop body
LE: loop exit
PB: predicated region body
PF: predicated region fallthrough
CT: control target
= control target key end

     0   :  { %vm20_vm0 = vcmask 261120   ;;  %vm22_vm1 = vcmask 254976   ;;  %v187_v1 = vmov 0   ;;  %s248_s0 = inlined_call_operand.vmem [shape: f32[10,32], index: 0, kind: input, shape index: {}]   ;;  %s249_s1 = inlined_call_operand.vmem [shape: s32[1,32], index: 1, kind: input, shape index: {}]   ;;  %s250_s2 = inlined_call_operand.vmem [shape: f32[10,1], index: 2, kind: input, shape index: {}]   ;;  %s251_s3 = inlined_call_operand.hbm [shape: f32[1,32], index: 3, kind: output, shape index: {}]  }
   0x1   :  { %v18_v0 = vld [vmem:[%s250_s2] sm:$0xff]  ;;  %150 = vset.pattern.permute.xlu0 %v187_v1  ;;  %v16_v3 = vld [vmem:[%s248_s0 + $0x8] sm:$0x3] }
   0x2   :  { %v15_v2 = vld [vmem:[%s248_s0] sm:$0xff]  ;;  %104 = vperm.xlu0 %150, %v18_v0   ;;  %v23_v5 = vsel %vm22_vm1, %v16_v3, -inf }
   0x3   :  { %v21_v4 = vsel %vm20_vm0, %v15_v2, -inf }
   0x4   :  { %8 = vsyncpa [#allocation3], 0  ;;  %v19_v6 = vld [vmem:[%s250_s2 + $0x8] sm:$0x3]  ;;  %v24_v7 = vmax.f32 %v21_v4, %v23_v5  ;;  %v87_v54 = vlaneseq  ;;  %vm131_vm7 = vcmask 253952  }
   0x6   :  { %v25_v8 = vrot.slane %v24_v7, 4  ;;  %109 = vperm.xlu0 %150, %v19_v6   ;;  %v88_v1 = vshrl.u32 %v87_v54, 7 }
   0x8   :  { %v26_v9 = vmax.f32 %v24_v7, %v25_v8  ;;  %v89_v7 = vadd.s32 8, %v88_v1 }
   0xa   :  { %v27_v10 = vrot.slane %v26_v9, 2 }
   0xc   :  { %v28_v11 = vmax.f32 %v26_v9, %v27_v10 }
   0xe   :  { %v29_v12 = vrot.slane %v28_v11, 1 }
  0x10   :  { %v30_v13 = vmax.f32 %v28_v11, %v29_v12 }
  0x12   :  { %v31_v14 = vsub.f32 %v15_v2, %v30_v13  ;;  %v32_v15 = vsub.f32 %v16_v3, %v30_v13  ;;  %v147_v3 = vld [vmem:[%s249_s1] ss:$0 sm:$0xff]  ;;  %s188_s1 = smov [#allocation2]  }
  0x13   :  { %vm94_vm4 = vcmp.eq.s32.totalorder %v88_v1, %v147_v3  ;;  %vm95_vm5 = vcmp.eq.s32.totalorder %v89_v7, %v147_v3  ;;  %s139_s20 = sshll.u32 %s188_s1, 4  ;;  %s140_s20 = int_to_ptr.vmem [resolvable:$true] %s139_s20 }
  0x14   :  { %v33_v16 = vmul.f32 1.442695, %v31_v14  ;;  %v35_v17 = vmul.f32 1.442695, %v32_v15  ;;  %s163_s21 = scalar_lea.vmem %s140_s20, 16  ;;  %s167_s22 = scalar_lea.vmem %s140_s20, 32 }
  0x15   :  { %p164_p0 = scmp.ne.s32.totalorder %s140_s20, %s163_s21  ;;  %p168_p1 = scmp.lt.s32.totalorder %s140_s20, %s140_s20 }
  0x16   :  { %151 = vpow2.f32 %v33_v16  ;;  %p169_p2 = scmp.lt.s32.totalorder %s167_s22, %s163_s21 }
  0x17   :  { %153 = vpow2.f32 %v35_v17 }
  0x18   :  { %p170_p3 = por %p169_p2, %p168_p1 }
  0x1a   :  { %p171_p4 = pnand %p170_p3, %p164_p0 }
  0x20   :  { %v152_v18 = vpop.eup %151 }
  0x21   :  { %v154_v19 = vpop.eup %153  ;;  %v37_v20 = vsel %vm20_vm0, %v152_v18, 0.0 }
  0x22   :  { %v38_v21 = vsel %vm22_vm1, %v154_v19, 0.0 }
  0x23   :  { %v39_v22 = vadd.f32 %v38_v21, %v37_v20 }
  0x25   :  { %v40_v23 = vrot.slane %v39_v22, 4 }
  0x27   :  { %v41_v24 = vadd.f32 %v40_v23, %v39_v22 }
  0x29   :  { %v42_v25 = vrot.slane %v41_v24, 2 }
  0x2b   :  { %v43_v26 = vadd.f32 %v42_v25, %v41_v24 }
  0x2d   :  { %v44_v27 = vrot.slane %v43_v26, 1 }
  0x2f   :  { %v45_v28 = vadd.f32 %v44_v27, %v43_v26  ;;  %v126_v26 = vand.u32 127, %v87_v54 }
  0x31   :  { %155 = vrcp.f32 %v45_v28  ;;  %vm129_vm6 = vcmp.lt.s32.totalorder %v126_v26, 32 }
  0x32   :  { %157 = vlog2.f32 %v45_v28 }
  0x3b   :  { %v156_v29 = vpop.eup %155 }
  0x3c   :  { %v47_v30 = vmul.f32 %v156_v29, %v152_v18  ;;  %v48_v31 = vmul.f32 %v156_v29, %v154_v19  ;;  %v158_v40 = vpop.eup %157 }
  0x3d   :  { %v54_v41 = vmul.f32 0.6931472, %v158_v40 }
  0x3e   :  { %v49_v32 = vmax.f32 %v47_v30, 1e-07  ;;  %v50_v33 = vmax.f32 %v48_v31, 1e-07 }
  0x3f   :  { %v55_v44 = vsub.f32 %v31_v14, %v54_v41  ;;  %v56_v48 = vsub.f32 %v32_v15, %v54_v41 }
  0x40   :  { %v51_v34 = vmin.f32 %v49_v32, 0.9999999  ;;  %v52_v35 = vmin.f32 %v50_v33, 0.9999999 }
  0x41   :  { %v57_v51 = vmax.f32 %v55_v44, -16.118095  ;;  %v58_v58 = vmax.f32 %v56_v48, -16.118095 }
  0x42   :  { %v61_v36 = vsub.f32 0.0, %v51_v34  ;;  %v62_v37 = vsub.f32 0.0, %v52_v35  ;;  %v81_v52 = vsub.f32 1.0, %v51_v34  ;;  %v82_v59 = vsub.f32 1.0, %v52_v35 }
  0x43   :  { %v59_v62 = vmin.f32 %v57_v51, -1.0000001e-07  ;;  %v85_v0 = vmul.f32 %v51_v34, %v51_v34  ;;  %v60_v4 = vmin.f32 %v58_v58, -1.0000001e-07  ;;  %v86_v6 = vmul.f32 %v52_v35, %v52_v35 }
  0x44   :  { %v63_v38 = vadd.f32 1.0, %v61_v36  ;;  %v72_v39 = vadd.f32 1.0, %v62_v37  ;;  %v66_v42 = vmul.f32 -0.5, %v61_v36  ;;  %v75_v43 = vmul.f32 -0.5, %v62_v37 }
  0x45   :  { %v69_v47 = vand.u32 2147483647, %v61_v36  ;;  %v78_v53 = vand.u32 2147483647, %v62_v37  ;;  %v83_v63 = vmul.f32 %v81_v52, %v81_v52  ;;  %v84_v5 = vmul.f32 %v82_v59, %v82_v59 }
  0x46   :  { %159 = vlog2.f32 %v63_v38  ;;  %v67_v45 = vadd.f32 1.0, %v66_v42  ;;  %v76_v49 = vadd.f32 1.0, %v75_v43 }
  0x47   :  { %161 = vlog2.f32 %v72_v39  ;;  %vm225_vm2 = vcmp.lt.f32.partialorder %v69_v47, 0.0004427343  ;;  %vm79_vm3 = vcmp.lt.f32.partialorder %v78_v53, 0.0004427343  ;;  %v96_v9 = vmul.f32 %v83_v63, %v59_v62 }
  0x48   :  { %v68_v56 = vmul.f32 %v67_v45, %v61_v36  ;;  %v77_v61 = vmul.f32 %v76_v49, %v62_v37  ;;  %v97_v11 = vmul.f32 %v84_v5, %v60_v4 }
  0x50   :  { %v160_v46 = vpop.eup %159 }
  0x51   :  { %v162_v50 = vpop.eup %161  ;;  %v65_v55 = vmul.f32 0.6931472, %v160_v46 }
  0x52   :  { %v74_v60 = vmul.f32 0.6931472, %v162_v50 }
  0x53   :  { %v71_v2 = vsel %vm225_vm2, %v68_v56, %v65_v55 }
  0x54   :  { %v80_v8 = vsel %vm79_vm3, %v77_v61, %v74_v60  ;;  %v98_v10 = vmul.f32 %v85_v0, %v71_v2 }
  0x55   :  { %v99_v12 = vmul.f32 %v86_v6, %v80_v8 }
  0x56   :  { %v100_v14 = vsel %vm94_vm4, %v96_v9, %v98_v10 }
  0x57   :  { %v101_v15 = vsel %vm95_vm5, %v97_v11, %v99_v12 }
  0x81   :  { %v105_v13 = vpop.permute.xlu0 %104 }
  0x82   :  { %v112_v16 = vmul.f32 %v105_v13, %v100_v14 }
  0x84   :  { %v114_v19 = vsel %vm20_vm0, %v112_v16, 0.0 }
  0x85   :  { %v110_v17 = vpop.permute.xlu0 %109 }
  0x86   :  { %v113_v18 = vmul.f32 %v110_v17, %v101_v15 }
  0x88   :  { %v115_v20 = vsel %vm22_vm1, %v113_v18, 0.0 }
  0x89   :  { %v116_v21 = vadd.f32 %v115_v20, %v114_v19 }
  0x8b   :  { %v117_v22 = vrot.slane %v116_v21, 4 }
  0x8d   :  { %v118_v23 = vadd.f32 %v117_v22, %v116_v21 }
  0x8f   :  { %v119_v24 = vrot.slane %v118_v23, 2 }
  0x91   :  { %v120_v25 = vadd.f32 %v119_v24, %v118_v23 }
  0x93   :  { %v121_v27 = vrot.slane %v120_v25, 1 }
  0x95   :  { %v122_v28 = vadd.f32 %v121_v27, %v120_v25 }
  0x97   :  { %v123_v29 = vsub.f32 0.0, %v122_v28 }
  0x99   :  { %v130_v30 = vsel %vm129_vm6, %v123_v29, 0.0 }
  0x9a   :  { %132 = vst.msk [vmem:[#allocation2] sm:$0x1] %vm131_vm7, %v130_v30 }
  0x9b   :  { %174 = shalt.err (!%p171_p4)
}
  0x9c   :  { %s175_s25 = scalar_lea.hbm %s251_s3, 16 }
  0x9d   :  { %p176_p5 = scmp.ne.s32.totalorder %s251_s3, %s175_s25  ;;  %p179_p6 = scmp.lt.u32.totalorder %s175_s25, %s251_s3 }
  0x9f   :  { %p181_p7 = pnand %p179_p6, %p176_p5 }
  0xa1   :  { %184 = shalt.err (!%p181_p7)
}
  0xa2   :  { %142 = dma.vmem_to_hbm [thread:$0]  %s140_s20, 16, %s251_s3, [#allocation3]  }
  0xa3   :  { %185 = dma.done.wait [#allocation3], 16  }
  0xa4   :  { %186 = vsyncadd [#allocation3], 4294967280 }
  0xa5   :  { %146 = vsyncpa [#allocation3], 1 }

</bundles_post_ra>
